<compile_context>
chip_gen: v7x
topology: tpu7x:2x2x1
jax: 0.10.0
libtpu: 0.0.40
codegen_flags: <defaults>
</compile_context>

<pallas_src>
import jax
import jax.numpy as jnp
from jax.experimental import pallas as pl
from jax.experimental.pallas import tpu as pltpu


# ---------------------------------------------------------------------------
# Kernel
# ---------------------------------------------------------------------------
def _copy_kernel(x_ref, o_ref):
    # identity copy of the current VMEM tile
    o_ref[...] = x_ref[...]


# ---------------------------------------------------------------------------
# Tiling policy
# ---------------------------------------------------------------------------
_LANE = 128
_MAX_LANE_WIDTH = 4096            # lane-dense last dim (large multiple of 128 -> unmasked vst)
_SUBLANE_MULTIPLE = 32            # safe sublane granularity for f32 / bf16 / int8 / fp8 packing
_TARGET_TILE_BYTES = 2 * 1024 * 1024   # ~2 MiB tile; x(in+out) x double-buffer ~= 8 MiB VMEM,
                                       # safe on every TPU generation's default scoped VMEM.


def _choose_lane_width(total):
    """Largest multiple of 128 (<= _MAX_LANE_WIDTH) dividing `total`, preferring >= 8 rows."""
    cands = [w for w in range(_LANE, _MAX_LANE_WIDTH + 1, _LANE) if total % w == 0]
    if not cands:
        return None
    tall = [w for w in cands if total // w >= 8]
    return max(tall) if tall else max(cands)


def _tiled_copy(x_flat, total, dtype):
    """Copy a 128-aligned flat buffer through VMEM with large lane-dense tiles."""
    itemsize = jnp.dtype(dtype).itemsize
    lane_w = _choose_lane_width(total)
    rows = total // lane_w
    x2d = jnp.reshape(x_flat, (rows, lane_w))

    target_rows = max(1, _TARGET_TILE_BYTES // (lane_w * itemsize))
    if target_rows >= rows:
        block_rows = rows  # whole array in one block (full-extent block is always legal)
    else:
        block_rows = max(_SUBLANE_MULTIPLE,
                         (target_rows // _SUBLANE_MULTIPLE) * _SUBLANE_MULTIPLE)

    grid = (pl.cdiv(rows, block_rows),)
    y2d = pl.pallas_call(
        _copy_kernel,
        out_shape=jax.ShapeDtypeStruct((rows, lane_w), dtype),
        grid_spec=pltpu.PrefetchScalarGridSpec(
            num_scalar_prefetch=0,
            grid=grid,
            in_specs=[pl.BlockSpec((block_rows, lane_w), lambda i: (i, 0))],
            out_specs=pl.BlockSpec((block_rows, lane_w), lambda i: (i, 0)),
        ),
        compiler_params=pltpu.CompilerParams(
            # Mem-bound copy: lets v7x shard the grid over its 2 TensorCores
            # (no-op on single-TC v5e/v6e).
            dimension_semantics=("parallel",),
        ),
    )(x2d)
    return jnp.reshape(y2d, (total,))


# ---------------------------------------------------------------------------
# View semantics (torch.view)
# ---------------------------------------------------------------------------
def _resolve_shape(shape, total):
    """Mimic torch.view's handling of a single -1 dimension."""
    shape = list(shape)
    if shape.count(-1) > 1:
        raise ValueError("only one dimension can be inferred")
    if -1 in shape:
        known = 1
        for s in shape:
            if s != -1:
                known *= s
        if known == 0 or total % known != 0:
            raise ValueError(f"cannot view {total} elements as shape {shape}")
        shape[shape.index(-1)] = total // known
    prod = 1
    for s in shape:
        prod *= s
    if prod != total:
        raise ValueError(f"cannot view {total} elements as shape {shape}")
    return tuple(shape)


def pallas_view(x, *shape):
    """Pallas implementation of View(*shape): y = x.view(*shape)."""
    total = int(x.size)
    out_shape = _resolve_shape(shape, total)
    if total == 0:
        return jnp.reshape(x, out_shape)

    x_flat = jnp.reshape(x, (total,))
    if total % _LANE == 0:
        # Main path: no padding, no extra HBM copy.
        y_flat = _tiled_copy(x_flat, total, x.dtype)
    else:
        # Rare fallback for totals not divisible by 128: pad up to the next lane multiple.
        # TODO(synk): handle the <=127-element tail with a masked store instead of jnp.pad
        # to avoid the extra HBM copy on oddly-sized inputs.
        padded = pl.cdiv(total, _LANE) * _LANE
        xp = jnp.pad(x_flat, (0, padded - total))
        y_flat = _tiled_copy(xp, padded, x.dtype)[:total]

    return jnp.reshape(y_flat, out_shape)


if __name__ == "__main__":
    key = jax.random.PRNGKey(0)
    # Small input consistent with a typical View usage, e.g. View(2, 4, -1)
    x = jax.random.normal(key, (2, 4, 16, 16), dtype=jnp.float32)

    # Equivalent of torch: View(2, 4, -1)(x)  ->  shape (2, 4, 256)
    y = pallas_view(x, 2, 4, -1)
    y = jax.block_until_ready(y)

    # Verify against plain reshape semantics (torch.view on contiguous == reshape)
    ref = jnp.reshape(x, (2, 4, 256))
    assert y.shape == (2, 4, 256), y.shape
    assert y.dtype == x.dtype
    assert bool(jnp.all(y == ref))

    print("KERNEL_OK")
</pallas_src>

<mosaic_0001>
module attributes {stable_mosaic.version = 11 : i64} {
  func.func @_copy_kernel(%arg0: i32, %arg1: memref<8x256xf32, #tpu.memory_space<vmem>>, %arg2: memref<8x256xf32, #tpu.memory_space<vmem>>) attributes {dimension_semantics = [#tpu.dimension_semantics<parallel>], iteration_bounds = array<i64: 1>, scalar_prefetch = 0 : i64, scratch_operands = 0 : i64, tpu.core_type = #tpu.core_type<tc>, window_params = [{transform_indices = @transform_0, window_bounds = array<i64: 8, 256>}, {transform_indices = @transform_1, window_bounds = array<i64: 8, 256>}]} {
    %c0 = arith.constant 0 : index
    %c0_0 = arith.constant 0 : index
    %0 = vector.load %arg1[%c0, %c0_0] : memref<8x256xf32, #tpu.memory_space<vmem>>, vector<8x256xf32>
    %c0_1 = arith.constant 0 : index
    %c0_2 = arith.constant 0 : index
    %1 = vector.load %arg2[%c0_1, %c0_2] : memref<8x256xf32, #tpu.memory_space<vmem>>, vector<8x256xf32>
    tpu.vector_store %arg2[%c0_1, %c0_2], %0 {strides = array<i32>} : memref<8x256xf32, #tpu.memory_space<vmem>>, vector<8x256xf32>,
    return
  }
  func.func @transform_0(%arg0: i32) -> (i32, i32) {
    %c0_i32 = arith.constant 0 : i32
    %c0_i32_0 = arith.constant 0 : i32
    return %arg0, %c0_i32 : i32, i32
  }
  func.func @transform_1(%arg0: i32) -> (i32, i32) {
    %c0_i32 = arith.constant 0 : i32
    %c0_i32_0 = arith.constant 0 : i32
    return %arg0, %c0_i32 : i32, i32
  }
}

</mosaic_0001>

<bundles_post_ra>
// kernel: tpu_custom_call.1
= control target key start
LH: loop header
LB: loop body
LE: loop exit
PB: predicated region body
PF: predicated region fallthrough
CT: control target
= control target key end

     0   :  { %6 = vsyncpa [#allocation3], 0  ;;  %s126_s0 = inlined_call_operand.hbm [shape: f32[8,256], index: 0, kind: input, shape index: {}]   ;;  %s127_s1 = inlined_call_operand.hbm [shape: f32[8,256], index: 1, kind: output, shape index: {}]  }
   0x1   :  { %7 = vsyncpa [#allocation4], 0  ;;  %s90_s6 = smov [#allocation2]   ;;  %s42_s10 = scalar_lea.hbm %s126_s0, 256 }
   0x2   :  { %s14_s7 = sshll.u32 %s90_s6, 4  ;;  %p43_p0 = scmp.ne.s32.totalorder %s126_s0, %s42_s10  ;;  %s15_s7 = int_to_ptr.vmem [resolvable:$true] %s14_s7 }
   0x3   :  { %p46_p1 = scmp.lt.u32.totalorder %s42_s10, %s126_s0 }
   0x5   :  { %p48_p2 = pnand %p46_p1, %p43_p0 }
   0x7   :  { %51 = shalt.err (!%p48_p2)
}
   0x8   :  { %s52_s15 = scalar_lea.vmem %s15_s7, 256  ;;  %p57_p4 = scmp.lt.s32.totalorder %s15_s7, %s15_s7 }
   0x9   :  { %p53_p3 = scmp.ne.s32.totalorder %s15_s7, %s52_s15  ;;  %p58_p5 = scmp.lt.s32.totalorder %s52_s15, %s52_s15 }
   0xb   :  { %p59_p6 = por %p58_p5, %p57_p4 }
   0xd   :  { %p60_p7 = pnand %p59_p6, %p53_p3 }
   0xf   :  { %63 = shalt.err (!%p60_p7)
}
  0x10   :  { %17 = dma.hbm_to_vmem [thread:$0]  %s126_s0, 256, %s15_s7, [#allocation3]  }
  0x11   :  { %86 = dma.done.wait [#allocation3], 256  }
  0x12   :  { %87 = vsyncadd [#allocation3], 4294967040  ;;  %s91_s18 = smov [#allocation5]   ;;  %v21_v0 = vld [vmem:[#allocation2] sm:$0xff]  ;;  %v22_v1 = vld [vmem:[#allocation2 + $0x8] sm:$0xff] }
  0x13   :  { %s31_s19 = sshll.u32 %s91_s18, 4  ;;  %23 = vst [vmem:[#allocation5] sm:$0xff] %v21_v0  ;;  %24 = vst [vmem:[#allocation5 + $0x8] sm:$0xff] %v22_v1  ;;  %s32_s19 = int_to_ptr.vmem [resolvable:$true] %s31_s19 }
  0x14   :  { %s64_s20 = scalar_lea.vmem %s32_s19, 256  ;;  %p69_p9 = scmp.lt.s32.totalorder %s32_s19, %s32_s19 }
  0x15   :  { %p65_p8 = scmp.ne.s32.totalorder %s32_s19, %s64_s20  ;;  %p70_p10 = scmp.lt.s32.totalorder %s64_s20, %s64_s20 }
  0x17   :  { %p71_p11 = por %p70_p10, %p69_p9 }
  0x19   :  { %p72_p12 = pnand %p71_p11, %p65_p8 }
  0x1b   :  { %75 = shalt.err (!%p72_p12)
}
  0x1c   :  { %s76_s0 = scalar_lea.hbm %s127_s1, 256 }
  0x1d   :  { %p77_p13 = scmp.ne.s32.totalorder %s127_s1, %s76_s0  ;;  %p80_p0 = scmp.lt.u32.totalorder %s76_s0, %s127_s1 }
  0x1f   :  { %p82_p1 = pnand %p80_p0, %p77_p13 }
  0x21   :  { %85 = shalt.err (!%p82_p1)
}
  0x22   :  { %34 = dma.vmem_to_hbm [thread:$0]  %s32_s19, 256, %s127_s1, [#allocation4]  }
  0x23   :  { %88 = dma.done.wait [#allocation4], 256  }
  0x24   :  { %89 = vsyncadd [#allocation4], 4294967040 }
  0x25   :  { %38 = vsyncpa [#allocation3], 1 }
  0x26   :  { %39 = vsyncpa [#allocation4], 1 }

</bundles_post_ra>
